<compile_context>
chip_gen: v5e
topology: v5e:2x2
jax: 0.10.0
libtpu: 0.0.40
codegen_flags: <defaults>
</compile_context>

<pallas_src>
import jax
import jax.numpy as jnp
from jax.experimental import pallas as pl
from jax.experimental.pallas import tpu as pltpu

_TARGET_BLOCK_BYTES = 2 * 1024 * 1024  # ~2 MiB per block: with in+out double-buffered
                                       # (2 arrays x 2 bufs) that is ~8 MiB of VMEM,
                                       # safely under every generation's default limit.


def _identity_kernel(x_ref, o_ref):
    # IdentityQuan.forward(x, bits) == x : pure pass-through copy of the tile.
    o_ref[...] = x_ref[...]


def _sublane_multiple(dtype) -> int:
    # Native packed sublane count: 8 for 4-byte, 16 for 2-byte, 32 for 1-byte dtypes.
    itemsize = jnp.dtype(dtype).itemsize
    return max(8, 32 // max(1, itemsize))


def _choose_layout(total, last_dim, sub):
    """Pick a lane-dense (rows, cols) flattening of the tensor."""
    # Best: cols a multiple of 128 AND rows a multiple of the packed sublane count.
    for cols in (1024, 512, 256, 128):
        if total % cols == 0 and (total // cols) % sub == 0:
            return total // cols, cols
    # Next best: lane-dense cols, arbitrary row count.
    for cols in (1024, 512, 256, 128):
        if total % cols == 0:
            return total // cols, cols
    # Fallback: keep the original trailing dim on the lane axis.
    last_dim = max(1, last_dim)
    return total // last_dim, last_dim


def _choose_row_tile(rows, cols, itemsize, sub):
    """Largest sublane-aligned row tile whose block is ~_TARGET_BLOCK_BYTES."""
    if rows <= sub:
        return rows  # full-dim block (always legal)
    row_bytes = max(1, cols * itemsize)
    tr = max(sub, (_TARGET_BLOCK_BYTES // row_bytes) // sub * sub)
    return min(tr, (rows // sub) * sub)


def identity_quan_forward(x, bits=None):
    """Pallas TPU equivalent of IdentityQuan.forward(x, bits) == x (`bits` ignored)."""
    orig_shape = x.shape
    dtype = x.dtype
    total = int(x.size)
    if total == 0:
        return x  # nothing to move

    itemsize = jnp.dtype(dtype).itemsize
    sub = _sublane_multiple(dtype)
    last_dim = x.shape[-1] if x.ndim >= 1 else 1

    rows, cols = _choose_layout(total, last_dim, sub)
    x2d = x.reshape(rows, cols)

    tr = _choose_row_tile(rows, cols, itemsize, sub)
    # v7x megacore: prefer >= 2 grid steps (when there is enough work) so both
    # TensorCores can each take a share of the rows.
    if tr == rows and rows >= 2 * sub:
        half = pl.cdiv(rows, 2)
        tr = max(sub, pl.cdiv(half, sub) * sub)

    grid = (pl.cdiv(rows, tr),)
    block = pl.BlockSpec((tr, cols), lambda i: (i, 0))

    y2d = pl.pallas_call(
        _identity_kernel,
        out_shape=jax.ShapeDtypeStruct((rows, cols), dtype),
        grid_spec=pltpu.PrefetchScalarGridSpec(
            num_scalar_prefetch=0,
            grid=grid,
            in_specs=[block],
            out_specs=block,
        ),
        # Output is bit-identical to the input: let XLA alias the HBM buffer.
        input_output_aliases={0: 0},
        # Pure memory traffic, zero flops — helps XLA overlap neighbouring ops.
        cost_estimate=pl.CostEstimate(
            flops=0,
            transcendentals=0,
            bytes_accessed=2 * rows * cols * itemsize,
        ),
        compiler_params=pltpu.CompilerParams(
            dimension_semantics=("parallel",),
        ),
    )(x2d)

    return y2d.reshape(orig_shape)


if __name__ == "__main__":
    key = jax.random.PRNGKey(0)
    # NCHW conv-style activation, small shapes.
    x = jax.random.normal(key, (2, 4, 16, 16), dtype=jnp.float32)
    x_host = jax.device_get(x)  # snapshot (robust even if the input buffer is aliased)

    y = identity_quan_forward(x, bits=None)
    jax.block_until_ready(y)

    assert y.shape == x.shape
    assert y.dtype == x.dtype
    assert bool(jnp.array_equal(y, jnp.asarray(x_host)))

    print("KERNEL_OK")
</pallas_src>

<mosaic_0001>
module attributes {stable_mosaic.version = 11 : i64} {
  func.func @_identity_kernel(%arg0: i32, %arg1: memref<8x256xf32, #tpu.memory_space<vmem>>, %arg2: memref<8x256xf32, #tpu.memory_space<vmem>>) attributes {dimension_semantics = [#tpu.dimension_semantics<parallel>], iteration_bounds = array<i64: 1>, scalar_prefetch = 0 : i64, scratch_operands = 0 : i64, tpu.core_type = #tpu.core_type<tc>, window_params = [{transform_indices = @transform_0, window_bounds = array<i64: 8, 256>}, {transform_indices = @transform_1, window_bounds = array<i64: 8, 256>}]} {
    %c0 = arith.constant 0 : index
    %c0_0 = arith.constant 0 : index
    %0 = vector.load %arg1[%c0, %c0_0] : memref<8x256xf32, #tpu.memory_space<vmem>>, vector<8x256xf32>
    %c0_1 = arith.constant 0 : index
    %c0_2 = arith.constant 0 : index
    %1 = vector.load %arg2[%c0_1, %c0_2] : memref<8x256xf32, #tpu.memory_space<vmem>>, vector<8x256xf32>
    tpu.vector_store %arg2[%c0_1, %c0_2], %0 {strides = array<i32>} : memref<8x256xf32, #tpu.memory_space<vmem>>, vector<8x256xf32>,
    return
  }
  func.func @transform_0(%arg0: i32) -> (i32, i32) {
    %c0_i32 = arith.constant 0 : i32
    %c0_i32_0 = arith.constant 0 : i32
    return %arg0, %c0_i32 : i32, i32
  }
  func.func @transform_1(%arg0: i32) -> (i32, i32) {
    %c0_i32 = arith.constant 0 : i32
    %c0_i32_0 = arith.constant 0 : i32
    return %arg0, %c0_i32 : i32, i32
  }
}

</mosaic_0001>

<bundles_post_ra>
// kernel: tpu_custom_call.1
= control target key start
LH: loop header
LB: loop body
LE: loop exit
PB: predicated region body
PF: predicated region fallthrough
CT: control target
= control target key end

     0   :  { %6 = vsyncpa [#allocation3], 0  ;;  %s116_s0 = inlined_call_operand.hbm [shape: f32[8,256], index: 0, kind: input, shape index: {}, may-alias: {0,1}]   ;;  %s117_s1 = inlined_call_operand.hbm [shape: f32[8,256], index: 1, kind: output, shape index: {}, may-alias: {0,1}]  }
   0x1   :  { %7 = vsyncpa [#allocation4], 0  ;;  %s13_s8 = sshll.u32 %s116_s0, 4  ;;  %s98_s9 = smov [#allocation2]   ;;  %s14_s8 = int_to_ptr.hbm [resolvable:$true] %s13_s8 }
   0x2   :  { %s15_s10 = sshll.u32 %s98_s9, 4  ;;  %s16_s10 = int_to_ptr.vmem [resolvable:$true] %s15_s10 }
   0x3   :  { %18 = dma.hbm_to_vmem [thread:$0]  %s14_s8, 256, %s16_s10, [#allocation3]  }
   0x4   :  { %94 = dma.done.wait [#allocation3], 256  }
   0x5   :  { %95 = vsyncadd [#allocation3], 4294967040  ;;  %s99_s11 = smov [#allocation5]   ;;  %s34_s15 = sshll.u32 %s117_s1, 4  ;;  %v23_v0 = vld [vmem:[#allocation2] sm:$0xff]  ;;  %v24_v1 = vld [vmem:[#allocation2 + $0x8] sm:$0xff]  ;;  %s35_s15 = int_to_ptr.hbm [resolvable:$true] %s34_s15 }
   0x6   :  { %s32_s12 = sshll.u32 %s99_s11, 4  ;;  %25 = vst [vmem:[#allocation5] sm:$0xff] %v23_v0  ;;  %s33_s12 = int_to_ptr.vmem [resolvable:$true] %s32_s12 }
   0x7   :  { %26 = vst [vmem:[#allocation5 + $0x8] sm:$0xff] %v24_v1 }
   0x8   :  { %37 = dma.vmem_to_hbm [thread:$0]  %s33_s12, 256, %s35_s15, [#allocation4]  }
   0x9   :  { %96 = dma.done.wait [#allocation4], 256  }
   0xa   :  { %97 = vsyncadd [#allocation4], 4294967040 }
   0xb   :  { %42 = vsyncpa [#allocation3], 1 }
   0xc   :  { %43 = vsyncpa [#allocation4], 1 }

</bundles_post_ra>
